<compile_context>
chip_gen: v6e
topology: v6e:2x2x1
jax: 0.10.0
libtpu: 0.0.40
codegen_flags: <defaults>
</compile_context>

<pallas_src>
import jax
import jax.numpy as jnp
from jax.experimental import pallas as pl
from jax.experimental.pallas import tpu as pltpu


_FUSED_LANE_CHUNK = 2048     # target lanes per in-kernel chunk on the fused path
_FUSED_MAX_CHUNKS = 64       # cap on statically unrolled full chunks


# ---------------------------------------------------------------------------
# helpers
# ---------------------------------------------------------------------------

def _round_up(x, m):
    return (x + m - 1) // m * m


def _vmem_capacity_bytes():
    """Physical VMEM of the local TPU generation (fallback: v7x's 64 MiB)."""
    try:
        return int(pltpu.get_tpu_info().vmem_capacity_bytes)
    except Exception:
        return 64 * 1024 * 1024


def _fused_chunking(HW):
    """Static lane-chunking for the fused kernel: chunk is a multiple of 128 and
    the number of full chunks is capped so the unrolled loop stays small."""
    chunk = _FUSED_LANE_CHUNK
    if HW > chunk * _FUSED_MAX_CHUNKS:
        chunk = _round_up(-(-HW // _FUSED_MAX_CHUNKS), 128)
    n_full = HW // chunk
    rem = HW - n_full * chunk
    return chunk, n_full, rem


def _fused_vmem_need(C, HW, dtype_bytes):
    """VMEM the fused kernel needs: double-buffered in+out slabs plus the
    chunk-sized f32 accumulator / cast temporaries (accounted explicitly; the
    full-slab f32 cast of the previous version is gone)."""
    slab = _round_up(C, 8) * _round_up(HW, 128) * dtype_bytes
    chunk, _, _ = _fused_chunking(HW)
    temps = 3 * _round_up(C, 8) * _round_up(min(HW, chunk), 128) * 4
    return 4 * slab + temps + (2 << 20)


def _pick_mode(N, C, HW, dtype_bytes):
    """Fused single pass iff the double-buffered slab (+ chunk temps) fits VMEM
    and the (N,)-grid has enough steps to pipeline."""
    cap = _vmem_capacity_bytes()
    if _fused_vmem_need(C, HW, dtype_bytes) > int(0.85 * cap):
        return "two_pass"
    slab = _round_up(C, 8) * _round_up(HW, 128) * dtype_bytes
    # With grid=(N,) a tiny batch gives the auto-pipeline too few steps to
    # overlap multi-MiB slab loads/stores; the tiled two-pass path overlaps
    # fully and exposes channel-group parallelism for v7x's two TensorCores.
    # TODO(synk): a manually double-buffered single-pass variant (pl.ANY +
    # make_async_copy) would keep the 2x HBM traffic for this case as well.
    if N <= 2 and slab > (8 << 20):
        return "two_pass"
    return "fused"


def _choose_channel_groups(N, C):
    """Expose >= 2 parallel grid cells for v7x's two TensorCores when the batch
    is tiny; neutral on 1-TC chips (v5e/v6e)."""
    if N >= 2:
        return 1
    for g in (2, 4):
        if C % g == 0 and (C // g) % 8 == 0:
            return g
    return 1


def _choose_hw_tile(c_block, HW, dtype_bytes, budget_bytes):
    """Lane tile for the HW axis (multiple of 128, or HW itself) sized to a VMEM
    budget that covers double-buffered blocks plus in-kernel f32 temps."""
    per_lane = c_block * max(2 * dtype_bytes + 8,     # pool : 2*in + cast + acc
                             4 * dtype_bytes + 4)     # scale: 2*in + 2*out + tmp
    lanes = budget_bytes // max(1, per_lane)
    lanes = min(int(lanes), 32768)
    lanes -= lanes % 128
    lanes = max(lanes, 128)
    if lanes >= HW:
        return HW, 1
    return lanes, -(-HW // lanes)


# ---------------------------------------------------------------------------
# fused single-pass kernel: one HBM read + one HBM write of x per batch
# ---------------------------------------------------------------------------

def _channel_attention_fused(x, w1, b1, prelu_a, w2, b2, *, donate_x=False):
    N, C, HW = x.shape
    Cr = w1.shape[0]
    inv_hw = 1.0 / float(HW)
    xbytes = jnp.dtype(x.dtype).itemsize

    w1f = w1.astype(jnp.float32)
    w2f = w2.astype(jnp.float32)
    b1c = b1.astype(jnp.float32).reshape(Cr, 1)
    b2c = b2.astype(jnp.float32).reshape(C, 1)
    a = jnp.asarray(prelu_a, jnp.float32).reshape(1)          # PReLU scalar -> SMEM

    chunk, n_full, rem = _fused_chunking(HW)

    def body(x_ref, w1_ref, b1_ref, w2_ref, b2_ref, a_ref, o_ref, acc_ref):
        # ---- squeeze: statically chunked per-channel sum (chunk-sized temps) --
        if acc_ref is not None:
            acc_ref[...] = jnp.zeros_like(acc_ref)
            for i in range(n_full):                    # static unroll, aligned
                off = i * chunk
                acc_ref[...] += x_ref[0, :, pl.ds(off, chunk)].astype(jnp.float32)
            pooled = jnp.sum(acc_ref[...], axis=-1, keepdims=True)      # (C, 1)
        else:
            pooled = jnp.zeros((C, 1), jnp.float32)

        if rem:                               # tail only; mask iff unaligned
            tail = x_ref[0, :, pl.ds(n_full * chunk, rem)].astype(jnp.float32)
            if rem % 128:
                lane = jax.lax.broadcasted_iota(jnp.int32, tail.shape, 1)
                tail = jnp.where(lane < rem, tail, 0.0)
            pooled = pooled + jnp.sum(tail, axis=-1, keepdims=True)

        pooled = pooled * inv_hw

        # ---- excitation: tiny FC -> PReLU -> FC -> sigmoid (all f32) ----------
        y1 = jnp.dot(w1_ref[...], pooled,
                     preferred_element_type=jnp.float32) + b1_ref[...]   # (Cr,1)
        alpha = a_ref[0]
        y1 = jnp.where(y1 > 0, y1, alpha * y1)
        y2 = jnp.dot(w2_ref[...], y1,
                     preferred_element_type=jnp.float32) + b2_ref[...]   # (C, 1)
        s = jax.nn.sigmoid(y2)                                           # (C, 1)

        # ---- scale: statically chunked broadcast multiply (f32 math) ----------
        def scale_chunk(off, width):
            xc = x_ref[0, :, pl.ds(off, width)].astype(jnp.float32)
            o_ref[0, :, pl.ds(off, width)] = (xc * s).astype(o_ref.dtype)

        for i in range(n_full):
            scale_chunk(i * chunk, chunk)
        if rem:
            scale_chunk(n_full * chunk, rem)

    if n_full > 0:
        def kernel(x_ref, w1_ref, b1_ref, w2_ref, b2_ref, a_ref, o_ref, acc_ref):
            body(x_ref, w1_ref, b1_ref, w2_ref, b2_ref, a_ref, o_ref, acc_ref)
        scratch_shapes = [pltpu.VMEM((C, chunk), jnp.float32)]
    else:
        def kernel(x_ref, w1_ref, b1_ref, w2_ref, b2_ref, a_ref, o_ref):
            body(x_ref, w1_ref, b1_ref, w2_ref, b2_ref, a_ref, o_ref, None)
        scratch_shapes = []

    cap = _vmem_capacity_bytes()
    vmem_limit = int(min(int(0.9 * cap),
                         max(32 << 20, _fused_vmem_need(C, HW, xbytes))))

    return pl.pallas_call(
        kernel,
        out_shape=jax.ShapeDtypeStruct((N, C, HW), x.dtype),
        grid=(N,),
        in_specs=[
            pl.BlockSpec((1, C, HW), lambda n: (n, 0, 0)),
            pl.BlockSpec((Cr, C), lambda n: (0, 0)),
            pl.BlockSpec((Cr, 1), lambda n: (0, 0)),
            pl.BlockSpec((C, Cr), lambda n: (0, 0)),
            pl.BlockSpec((C, 1), lambda n: (0, 0)),
            pl.BlockSpec(memory_space=pltpu.MemorySpace.SMEM),   # PReLU scalar
        ],
        out_specs=pl.BlockSpec((1, C, HW), lambda n: (n, 0, 0)),
        scratch_shapes=scratch_shapes,
        input_output_aliases=({0: 0} if donate_x else {}),
        compiler_params=pltpu.CompilerParams(
            dimension_semantics=("parallel",),
            vmem_limit_bytes=vmem_limit),
    )(x, w1f, b1c, w2f, b2c, a)


# ---------------------------------------------------------------------------
# two-pass (VMEM-safe) path: tiled pooling -> tiny FC in plain JAX -> tiled scale
# ---------------------------------------------------------------------------

def _channel_attention_two_pass(x, w1, b1, prelu_a, w2, b2, *,
                                donate_x=False, hw_tile=None):
    N, C, HW = x.shape
    xbytes = jnp.dtype(x.dtype).itemsize
    cap = _vmem_capacity_bytes()

    G = _choose_channel_groups(N, C)
    Cg = C // G

    # Generation-aware streaming-tile budget: big tiles (fewer ~0.35us grid
    # steps) on 128 MiB VMEM chips (v5e/v6e), tighter on v7x's 64 MiB.
    budget = (24 << 20) if cap >= (96 << 20) else (12 << 20)
    if hw_tile is not None:
        tile = min(int(hw_tile), HW)
        if tile < HW:
            tile = max(128, tile - tile % 128)
        T = -(-HW // tile)
    else:
        tile, T = _choose_hw_tile(Cg, HW, xbytes, budget)

    # Explicit scoped-VMEM limits derived from actual per-step usage (keeps the
    # pipeline double-buffered on v5e's 16 MiB default, stays under v7x's cap).
    pool_limit = int(min(int(0.9 * cap),
                         max(32 << 20, Cg * tile * (2 * xbytes + 12) + (4 << 20))))
    scale_limit = int(min(int(0.9 * cap),
                          max(32 << 20, Cg * tile * (4 * xbytes + 8) + (4 << 20))))

    # ---- pass 1: per-channel sums; f32 accumulator in VMEM scratch (VPU adds),
    #      one cross-lane reduce + narrow store per (n, g), tail-only masking ---
    if T > 1:
        tail_partial = (HW % tile) != 0

        def pool_kernel(x_ref, sum_ref, acc_ref):
            t = pl.program_id(2)

            @pl.when(t == 0)
            def _():
                acc_ref[...] = jnp.zeros_like(acc_ref)

            if tail_partial:
                @pl.when(t < T - 1)
                def _():
                    acc_ref[...] += x_ref[0].astype(jnp.float32)

                @pl.when(t == T - 1)
                def _():
                    xf = x_ref[0].astype(jnp.float32)
                    lane = (jax.lax.broadcasted_iota(jnp.int32, xf.shape, 1)
                            + (T - 1) * tile)
                    acc_ref[...] += jnp.where(lane < HW, xf, 0.0)
            else:
                acc_ref[...] += x_ref[0].astype(jnp.float32)

            @pl.when(t == T - 1)
            def _():
                sum_ref[0] = jnp.sum(acc_ref[...], axis=-1, keepdims=True)

        pool_scratch = [pltpu.VMEM((Cg, tile), jnp.float32)]
    else:
        def pool_kernel(x_ref, sum_ref):
            xf = x_ref[0].astype(jnp.float32)                     # (Cg, HW)
            if (HW % 128) != 0:
                lane = jax.lax.broadcasted_iota(jnp.int32, xf.shape, 1)
                xf = jnp.where(lane < HW, xf, 0.0)
            sum_ref[0] = jnp.sum(xf, axis=-1, keepdims=True)

        pool_scratch = []

    sums = pl.pallas_call(
        pool_kernel,
        out_shape=jax.ShapeDtypeStruct((N, C, 1), jnp.float32),
        grid=(N, G, T),
        in_specs=[pl.BlockSpec((1, Cg, tile), lambda n, g, t: (n, g, t))],
        out_specs=pl.BlockSpec((1, Cg, 1), lambda n, g, t: (n, g, 0)),
        scratch_shapes=pool_scratch,
        compiler_params=pltpu.CompilerParams(
            dimension_semantics=("parallel", "parallel", "arbitrary"),
            vmem_limit_bytes=pool_limit),
    )(x)

    # ---- tiny squeeze-excite FC for all N at once (hoisted out of Pallas) -----
    pooled = sums[:, :, 0] * jnp.float32(1.0 / HW)                 # (N, C) f32
    y1 = pooled @ w1.astype(jnp.float32).T + b1.astype(jnp.float32)[None, :]
    alpha = jnp.asarray(prelu_a, jnp.float32)
    y1 = jnp.where(y1 > 0, y1, alpha * y1)
    y2 = y1 @ w2.astype(jnp.float32).T + b2.astype(jnp.float32)[None, :]
    s = jax.nn.sigmoid(y2)[:, :, None]                             # (N, C, 1) f32

    # ---- pass 2: broadcast multiply on a fully parallel (N, G, T) grid --------
    def scale_kernel(x_ref, s_ref, o_ref):
        o_ref[0] = (x_ref[0].astype(jnp.float32) * s_ref[0]).astype(o_ref.dtype)

    out = pl.pallas_call(
        scale_kernel,
        out_shape=jax.ShapeDtypeStruct((N, C, HW), x.dtype),
        grid=(N, G, T),
        in_specs=[
            pl.BlockSpec((1, Cg, tile), lambda n, g, t: (n, g, t)),
            pl.BlockSpec((1, Cg, 1), lambda n, g, t: (n, g, 0)),
        ],
        out_specs=pl.BlockSpec((1, Cg, tile), lambda n, g, t: (n, g, t)),
        input_output_aliases=({0: 0} if donate_x else {}),
        compiler_params=pltpu.CompilerParams(
            dimension_semantics=("parallel", "parallel", "parallel"),
            vmem_limit_bytes=scale_limit),
    )(x, s)
    return out


# ---------------------------------------------------------------------------
# public wrapper + reference
# ---------------------------------------------------------------------------

def channel_attention(x_nchw, w1, b1, prelu_a, w2, b2, *,
                      mode="auto", donate_x=False, hw_tile=None):
    """MIRNet ChannelAttention forward.

    x_nchw: (N, C, H, W) in its native dtype (f32/bf16).  w1: (C_r, C),
    b1: (C_r,), w2: (C, C_r), b2: (C,), prelu_a: scalar PReLU weight.
    mode: "auto" | "fused" | "two_pass".  donate_x aliases x -> out when the
    caller can donate x.  hw_tile overrides the two-pass lane tile (testing).
    """
    N, C, H, W = x_nchw.shape
    HW = H * W
    x = x_nchw.reshape(N, C, HW)

    if mode == "auto":
        mode = _pick_mode(N, C, HW, jnp.dtype(x.dtype).itemsize)
    if mode == "fused":
        out = _channel_attention_fused(x, w1, b1, prelu_a, w2, b2,
                                       donate_x=donate_x)
    elif mode == "two_pass":
        out = _channel_attention_two_pass(x, w1, b1, prelu_a, w2, b2,
                                          donate_x=donate_x, hw_tile=hw_tile)
    else:
        raise ValueError(f"unknown mode {mode!r}")
    return out.reshape(N, C, H, W)


def channel_attention_ref(x, w1, b1, prelu_a, w2, b2):
    """Pure-JAX reference mirroring the PyTorch module."""
    pooled = jnp.mean(x.astype(jnp.float32), axis=(2, 3), keepdims=True)
    y1 = jnp.einsum('oc,nchw->nohw', w1, pooled) + b1[None, :, None, None]
    y1 = jnp.where(y1 > 0, y1, prelu_a * y1)
    y2 = jnp.einsum('oc,nchw->nohw', w2, y1) + b2[None, :, None, None]
    s = jax.nn.sigmoid(y2)
    return (s * x).astype(x.dtype)


if __name__ == "__main__":
    key = jax.random.PRNGKey(0)

    # (N, C, H, W), reduction_ratio, forced two-pass HW tile (None -> auto):
    #  - (2,16,16,16): aligned HW, plain paths
    #  - (2,16,12,12): HW=144 (non-128-multiple) -> tail-masked paths
    #  - (1,16,16,16): N=1 -> channel-group (G=2) grids in the two-pass path
    #  - (2,16,47,47): HW=2209 > fused lane chunk -> chunked fused reduction
    #                  with an unaligned remainder; the forced 128-lane tile
    #                  exercises the multi-step two-pass accumulator.
    configs = [((2, 16, 16, 16), 8, None),
               ((2, 16, 12, 12), 8, None),
               ((1, 16, 16, 16), 8, None),
               ((2, 16, 47, 47), 8, 128)]

    for shape, rr, hw_tile in configs:
        N, C, H, W = shape
        Cr = C // rr
        key, kx, kw1, kb1, kw2, kb2 = jax.random.split(key, 6)
        x = jax.random.normal(kx, shape, dtype=jnp.float32)
        # Conv2d 1x1 weights squeezed to 2-D.
        w1 = jax.random.normal(kw1, (Cr, C), dtype=jnp.float32) * 0.2
        b1 = jax.random.normal(kb1, (Cr,), dtype=jnp.float32) * 0.1
        w2 = jax.random.normal(kw2, (C, Cr), dtype=jnp.float32) * 0.2
        b2 = jax.random.normal(kb2, (C,), dtype=jnp.float32) * 0.1
        prelu_a = 0.25   # nn.PReLU() default single-parameter init

        ref = channel_attention_ref(x, w1, b1, prelu_a, w2, b2)
        for mode in ("auto", "fused", "two_pass"):
            out = jax.block_until_ready(
                channel_attention(x, w1, b1, prelu_a, w2, b2,
                                  mode=mode, hw_tile=hw_tile))
            assert out.shape == shape
            assert jnp.allclose(out, ref, atol=2e-5, rtol=1e-5), \
                f"mismatch vs reference: shape={shape} mode={mode}"

    print("KERNEL_OK")
</pallas_src>

<mosaic_0001>
module attributes {stable_mosaic.version = 11 : i64} {
  func.func @kernel(%arg0: i32, %arg1: memref<1x16x256xf32, #tpu.memory_space<vmem>>, %arg2: memref<2x16xf32, #tpu.memory_space<vmem>>, %arg3: memref<2x1xf32, #tpu.memory_space<vmem>>, %arg4: memref<16x2xf32, #tpu.memory_space<vmem>>, %arg5: memref<16x1xf32, #tpu.memory_space<vmem>>, %arg6: memref<1xf32, #tpu.memory_space<smem>>, %arg7: memref<1x16x256xf32, #tpu.memory_space<vmem>>) attributes {dimension_semantics = [#tpu.dimension_semantics<parallel>], iteration_bounds = array<i64: 2>, scalar_prefetch = 0 : i64, scratch_operands = 0 : i64, tpu.core_type = #tpu.core_type<tc>, window_params = [{transform_indices = @transform_0, window_bounds = array<i64: 1, 16, 256>}, {pipeline_mode = #tpu.pipeline_mode<synchronous>, transform_indices = @transform_1, window_bounds = array<i64: 2, 16>}, {pipeline_mode = #tpu.pipeline_mode<synchronous>, transform_indices = @transform_2, window_bounds = array<i64: 2, 1>}, {pipeline_mode = #tpu.pipeline_mode<synchronous>, transform_indices = @transform_3, window_bounds = array<i64: 16, 2>}, {pipeline_mode = #tpu.pipeline_mode<synchronous>, transform_indices = @transform_4, window_bounds = array<i64: 16, 1>}, {transform_indices = @transform_5, window_bounds = array<i64: 1>}, {transform_indices = @transform_6, window_bounds = array<i64: 1, 16, 256>}]} {
    %cst = arith.constant 0.000000e+00 : f32
    %0 = vector.broadcast %cst : f32 to vector<16x1xf32>
    %c0 = arith.constant 0 : index
    %c0_0 = arith.constant 0 : index
    %c0_1 = arith.constant 0 : index
    %1 = vector.load %arg1[%c0, %c0_0, %c0_1] : memref<1x16x256xf32, #tpu.memory_space<vmem>>, vector<1x16x256xf32>
    %2 = vector.shape_cast %1 : vector<1x16x256xf32> to vector<16x256xf32>
    %cst_2 = arith.constant dense<0.000000e+00> : vector<16xf32>
    %3 = vector.multi_reduction <add>, %2, %cst_2 [1] : vector<16x256xf32> to vector<16xf32>
    %4 = vector.shape_cast %3 : vector<16xf32> to vector<16x1xf32>
    %5 = arith.addf %0, %4 : vector<16x1xf32>
    %cst_3 = arith.constant 3.906250e-03 : f32
    %6 = vector.broadcast %cst_3 : f32 to vector<16x1xf32>
    %7 = arith.mulf %5, %6 : vector<16x1xf32>
    %c0_4 = arith.constant 0 : index
    %c0_5 = arith.constant 0 : index
    %8 = vector.load %arg2[%c0_4, %c0_5] : memref<2x16xf32, #tpu.memory_space<vmem>>, vector<2x16xf32>
    %cst_6 = arith.constant dense<0.000000e+00> : vector<2x1xf32>
    %9 = tpu.matmul %8, %7, %cst_6 {dimension_numbers = #tpu.dot_dimension_numbers<[1], [0], [0], [1], [0, 0, 1, 1], [], []>} : vector<2x16xf32>, vector<16x1xf32>, vector<2x1xf32> -> vector<2x1xf32>
    %c0_7 = arith.constant 0 : index
    %c0_8 = arith.constant 0 : index
    %10 = vector.load %arg3[%c0_7, %c0_8] : memref<2x1xf32, #tpu.memory_space<vmem>>, vector<2x1xf32>
    %11 = arith.addf %9, %10 : vector<2x1xf32>
    %c0_9 = arith.constant 0 : index
    %12 = memref.load %arg6[%c0_9] : memref<1xf32, #tpu.memory_space<smem>>
    %cst_10 = arith.constant 0.000000e+00 : f32
    %13 = vector.broadcast %cst_10 : f32 to vector<2x1xf32>
    %14 = arith.cmpf ogt, %11, %13 : vector<2x1xf32>
    %15 = vector.broadcast %12 : f32 to vector<2x1xf32>
    %16 = arith.mulf %15, %11 : vector<2x1xf32>
    %17 = arith.select %14, %11, %16 : vector<2x1xi1>, vector<2x1xf32>
    %c0_11 = arith.constant 0 : index
    %c0_12 = arith.constant 0 : index
    %18 = vector.load %arg4[%c0_11, %c0_12] : memref<16x2xf32, #tpu.memory_space<vmem>>, vector<16x2xf32>
    %cst_13 = arith.constant dense<0.000000e+00> : vector<16x1xf32>
    %19 = tpu.matmul %18, %17, %cst_13 {dimension_numbers = #tpu.dot_dimension_numbers<[1], [0], [0], [1], [0, 0, 1, 1], [], []>} : vector<16x2xf32>, vector<2x1xf32>, vector<16x1xf32> -> vector<16x1xf32>
    %c0_14 = arith.constant 0 : index
    %c0_15 = arith.constant 0 : index
    %20 = vector.load %arg5[%c0_14, %c0_15] : memref<16x1xf32, #tpu.memory_space<vmem>>, vector<16x1xf32>
    %21 = arith.addf %19, %20 : vector<16x1xf32>
    %22 = arith.negf %21 : vector<16x1xf32>
    %23 = math.exp %22 : vector<16x1xf32>
    %cst_16 = arith.constant 1.000000e+00 : f32
    %24 = vector.broadcast %cst_16 : f32 to vector<16x1xf32>
    %25 = arith.addf %24, %23 : vector<16x1xf32>
    %26 = arith.divf %24, %25 : vector<16x1xf32>
    %c0_17 = arith.constant 0 : index
    %c0_18 = arith.constant 0 : index
    %c0_19 = arith.constant 0 : index
    %27 = vector.load %arg1[%c0_17, %c0_18, %c0_19] : memref<1x16x256xf32, #tpu.memory_space<vmem>>, vector<1x16x256xf32>
    %28 = vector.shape_cast %27 : vector<1x16x256xf32> to vector<16x256xf32>
    %29 = vector.broadcast %26 : vector<16x1xf32> to vector<16x256xf32>
    %30 = arith.mulf %28, %29 : vector<16x256xf32>
    %c0_20 = arith.constant 0 : index
    %c0_21 = arith.constant 0 : index
    %c0_22 = arith.constant 0 : index
    %31 = vector.load %arg7[%c0_20, %c0_21, %c0_22] : memref<1x16x256xf32, #tpu.memory_space<vmem>>, vector<1x16x256xf32>
    %32 = vector.shape_cast %31 : vector<1x16x256xf32> to vector<16x256xf32>
    %33 = vector.shape_cast %30 : vector<16x256xf32> to vector<1x16x256xf32>
    tpu.vector_store %arg7[%c0_20, %c0_21, %c0_22], %33 {strides = array<i32>} : memref<1x16x256xf32, #tpu.memory_space<vmem>>, vector<1x16x256xf32>,
    return
  }
  func.func @transform_0(%arg0: i32) -> (i32, i32, i32) {
    %c0_i32 = arith.constant 0 : i32
    %c0_i32_0 = arith.constant 0 : i32
    %c0_i32_1 = arith.constant 0 : i32
    return %arg0, %c0_i32, %c0_i32_0 : i32, i32, i32
  }
  func.func @transform_1(%arg0: i32) -> (i32, i32) {
    %c0_i32 = arith.constant 0 : i32
    %c0_i32_0 = arith.constant 0 : i32
    %c0_i32_1 = arith.constant 0 : i32
    return %c0_i32, %c0_i32_0 : i32, i32
  }
  func.func @transform_2(%arg0: i32) -> (i32, i32) {
    %c0_i32 = arith.constant 0 : i32
    %c0_i32_0 = arith.constant 0 : i32
    %c0_i32_1 = arith.constant 0 : i32
    return %c0_i32, %c0_i32_0 : i32, i32
  }
  func.func @transform_3(%arg0: i32) -> (i32, i32) {
    %c0_i32 = arith.constant 0 : i32
    %c0_i32_0 = arith.constant 0 : i32
    %c0_i32_1 = arith.constant 0 : i32
    return %c0_i32, %c0_i32_0 : i32, i32
  }
  func.func @transform_4(%arg0: i32) -> (i32, i32) {
    %c0_i32 = arith.constant 0 : i32
    %c0_i32_0 = arith.constant 0 : i32
    %c0_i32_1 = arith.constant 0 : i32
    return %c0_i32, %c0_i32_0 : i32, i32
  }
  func.func @transform_5(%arg0: i32) -> i32 {
    %c0_i32 = arith.constant 0 : i32
    %c0_i32_0 = arith.constant 0 : i32
    return %c0_i32 : i32
  }
  func.func @transform_6(%arg0: i32) -> (i32, i32, i32) {
    %c0_i32 = arith.constant 0 : i32
    %c0_i32_0 = arith.constant 0 : i32
    %c0_i32_1 = arith.constant 0 : i32
    return %arg0, %c0_i32, %c0_i32_0 : i32, i32, i32
  }
}

</mosaic_0001>

<bundles_post_ra>
// kernel: tpu_custom_call.1
= control target key start
LH: loop header
LB: loop body
LE: loop exit
PB: predicated region body
PF: predicated region fallthrough
CT: control target
= control target key end

     0   :  { %s1005_s0 = inlined_call_operand.hbm [shape: f32[2,16,256], index: 0, kind: input, shape index: {}]   ;;  %s1006_s1 = inlined_call_operand.vmem [shape: f32[2,16], index: 1, kind: input, shape index: {}]   ;;  %s1007_s2 = inlined_call_operand.vmem [shape: f32[2,1], index: 2, kind: input, shape index: {}]   ;;  %s1008_s3 = inlined_call_operand.vmem [shape: f32[16,2], index: 3, kind: input, shape index: {}]   ;;  %s1009_s4 = inlined_call_operand.vmem [shape: f32[16,1], index: 4, kind: input, shape index: {}]   ;;  %s1010_s5 = inlined_call_operand.<no memory space> [shape: f32[1], index: 5, kind: input, shape index: {}]   ;;  %s1011_s6 = inlined_call_operand.hbm [shape: f32[2,16,256], index: 6, kind: output, shape index: {}]  }
   0x1   :  { %11 = sst [smem:[#allocation2]] %s1010_s5 }
   0x2   :  { %12 = vsyncpa [#allocation4], 0 }
   0x3   :  { %14 = vsyncpa [#allocation4 + $0x1], 0 }
   0x4   :  { %15 = vsyncpa [#allocation5], 0 }
   0x5   :  { %17 = vsyncpa [#allocation5 + $0x1], 0  ;;  %s817_s23 = smov 0   ;;  %s819_s24 = smov 0  }
   0x6   :  { %s821_s25 = smov 0   ;;  %s823_s26 = smov 0  }
   0x7 LB: > { %s838_s5 = sadd.s32 4294967295, %s768_s26   ;;  %s573_s27 = sadd.s32 4294967294, %s768_s26   ;;  %s768_s26 = sphi %s823_s26, %s1026_s26   ;;  %s764_s25 = sphi %s821_s25, %s1025_s25   ;;  %s760_s24 = sphi %s819_s24, %s1024_s24   ;;  %s756_s23 = sphi %s817_s23, %s1023_s23  }
   0x8   : > { %s842_s28 = sadd.s32 1, %s768_s26   ;;  %s30_s29 = sadd.s32 1, %s764_s25 }
   0x9   : > { %s27_s30 = ssub.s32 %s768_s26, %s842_s28  ;;  %p37_p0 = scmp.ne.s32.totalorder %s764_s25, %s760_s24 }
   0xa   : > { %p28_p1 = scmp.eq.s32.totalorder %s27_s30, 0  ;;  %p38_p2 = scmp.eq.s32.totalorder %s768_s26, 0 }
   0xb   : > { %p43_p3 = scmp.ne.s32.totalorder %s760_s24, %s756_s23  ;;  %p44_p4 = scmp.eq.s32.totalorder %s838_s5, 0 }
   0xc   : > { %s854_s7 = scalar_select %p28_p1, %s764_s25, %s30_s29  }
   0xd   : > { %p856_p5 = por %p38_p2, %p37_p0  ;;  %p860_p6 = por %p44_p4, %p43_p3 }
   0xe   : > { %p172_p7 = scmp.eq.s32.totalorder %s838_s5, 1  ;;  %p178_p8 = scmp.eq.s32.totalorder %s573_s27, 1 }
   0xf   : > { %s1015_s9 = scalar_select %p860_p6, 1, 0 }
  0x10   : > { %p625_p10 = scmp.lt.s32.totalorder %s768_s26, 2  ;;  %p867_p11 = por %p172_p7, %p37_p0 }
  0x11   : > { %p871_p12 = por %p178_p8, %p43_p3  ;;  %s213_s12 = sand.u32 1, %s764_s25  }
  0x12   : > { %s1016_s10 = scalar_select %p867_p11, 1, 0 }
  0x13   : > { %s1017_s11 = scalar_select %p871_p12, 1, 0 }
  0x14   : > { %s593_s13 = sshll.u32 %s768_s26, 9  ;;  %s576_s14 = sshll.u32 %s213_s12, 5 }
  0x15   : > { %s880_s17 = scalar_lea.hbm %s1005_s0, %s593_s13  ;;  %s217_s18 = scalar_lea.vmem [#allocation3], %s576_s14 }
  0x16   : > { %s224_s19 = sshll.u32 %s217_s18, 4  ;;  %p884_p13 = pnand %p625_p10, %p856_p5  ;;  %s888_s19 = int_to_ptr.vmem [resolvable:$true] %s224_s19 }
  0x17   : > { %s890_s21 = scalar_lea.sflag [#allocation4], %s213_s12  ;;  %s676_s22 = scalar_lea.hbm %s880_s17, 512 }
  0x18   : > { %p677_p0 = scmp.ne.s32.totalorder %s880_s17, %s676_s22  ;;  %p678_p1 = pneg %p884_p13 }
  0x19   : > { %s681_s30 = scalar_lea.hbm %s1005_s0, 1024  ;;  %p682_p4 = scmp.lt.s32.totalorder %s880_s17, %s1005_s0 }
  0x1a   : > { %p679_p2 = pnand %p678_p1, %p677_p0  ;;  %p683_p5 = scmp.lt.s32.totalorder %s681_s30, %s676_s22 }
  0x1c   : > { %p680_p3 = pneg %p679_p2  ;;  %p684_p7 = por %p683_p5, %p682_p4 }
  0x1e   : > { %p685_p8 = pnand %p684_p7, %p680_p3 }
  0x20   : > { %688 = shalt.err (!%p685_p8)
}
  0x21   : > { %s689_s12 = scalar_lea.vmem %s888_s19, 512  ;;  %s770_s14 = smov [#allocation3]  }
  0x22   : > { %p690_p10 = scmp.ne.s32.totalorder %s888_s19, %s689_s12  ;;  %s694_s15 = sshll.u32 %s770_s14, 4  ;;  %s695_s15 = int_to_ptr.vmem [resolvable:$false] %s694_s15 }
  0x23   : > { %s696_s16 = scalar_lea.vmem %s695_s15, 1024  ;;  %p697_p2 = scmp.lt.s32.totalorder %s888_s19, %s695_s15 }
  0x24   : > { %p692_p9 = pnand %p690_p10, %p678_p1  ;;  %p698_p12 = scmp.lt.s32.totalorder %s696_s16, %s689_s12 }
  0x26   : > { %p693_p0 = pneg %p692_p9  ;;  %p699_p11 = por %p698_p12, %p697_p2 }
  0x28   : > { %p700_p6 = pnand %p699_p11, %p693_p0 }
  0x2a   : > { %703 = shalt.err (!%p700_p6)
}
  0x2b   : > { %s771_s18 = smov 256   ;;  %s772_s22 = smov 16  }
  0x2c   : > { %620 = dma.hbm_to_vmem [thread:$0]  (!%p884_p13), %s880_s17, 512, %s888_s19, %s890_s21, %s771_s18, %s771_s18, %s772_s22  }
  0x2d   : > { %p579_p9 = scmp.ge.s32.totalorder %s768_s26, 1  ;;  %p232_p1 = scmp.lt.s32.totalorder %s768_s26, 3 }
  0x2f   : > { %p233_p3 = pnand %p579_p9, %p232_p1 }
  0x30   : > { %s914_s27 = sand.u32 (!%p233_p3), 1, %s760_s24   ;;  %p1019_p6 = scmp.ne.s32.totalorder (!%p233_p3), %s1015_s9, 0 }
  0x31   : > { %236 = sbr.rel (%p233_p3) target bundleno = 776 (0x308), region = 44  ;;  %s580_s29 = sshll.u32 (!%p233_p3), %s914_s27, 5 }
  0x32   : > { %s239_s30 = scalar_lea.sflag (!%p233_p3), [#allocation4], %s914_s27  ;;  %s242_s8 = scalar_lea.vmem (!%p233_p3), [#allocation3], %s580_s29 }
  0x36   : > { %747 = dma.done.wait (%p1019_p6), %s239_s30, 512  }
  0x37   : > { %749 = vsyncadd (%p1019_p6), %s239_s30, 4294966784  ;;  %v924_v0 = vld [vmem:[%s242_s8 + $0x10] sm:$0xff]  ;;  %v926_v1 = vld [vmem:[%s242_s8 + $0x18] sm:$0xff]  ;;  %v773_v6 = vmov 0.0   ;;  %vm774_vm0 = vmmov 0   ;;  %vm287_vm1 = vcmask 130048  }
  0x38   : > { %v928_v2 = vld [vmem:[%s242_s8] sm:$0xff]  ;;  %v278_v3 = vadd.f32 %v926_v1, %v924_v0  ;;  %v272_v4 = vld [vmem:[%s242_s8 + $0x8] sm:$0xff]  ;;  %601 = vmatprep.subr.mxu0 %v773_v6  ;;  %605 = vmatprep.mubr.msk.f32.mxu0 %vm774_vm0, %v773_v6  ;;  %vm370_vm2 = vcmask 15360   ;;  %s361_s21 = sld [smem:[#allocation2]]  ;;  %vm377_vm4 = vcmask 1041408   ;;  %v775_v21 = vmov 0  }
  0x39   : > { %v275_v5 = vadd.f32 %v272_v4, %v928_v2  ;;  %v285_v11 = vld [vmem:[%s1006_s1] sm:$0x3]  ;;  %v367_v20 = vld [vmem:[%s1008_s3 + $0x8] sm:$0xff]  ;;  %666 = vset.pattern.permute.xlu1 %v775_v21  ;;  %667 = vset.pattern.permute.xlu0 %v775_v21  ;;  %s270_s8 = scalar_lea.vmem [#allocation6], %s580_s29  ;;  %s594_s17 = sshll.u32 %s838_s5, 9 }
  0x3a   : > { %279 = vadd.xlane.f32.xlu0 %v278_v3  ;;  %v366_v12 = vld [vmem:[%s1008_s3] sm:$0xff]  ;;  %v369_v22 = vld [vmem:[%s1009_s4 + $0x8] sm:$0xff]  ;;  %s500_s9 = sshll.u32 %s270_s8, 4  ;;  %s487_s5 = scalar_lea.sflag [#allocation5], %s914_s27  ;;  %s955_s9 = int_to_ptr.vmem [resolvable:$true] %s500_s9 }
  0x3b   : > { %610 = vmatprep.mubr.msk.f32.mxu1 %vm370_vm2, %v366_v12  ;;  %v286_v13 = vld [vmem:[%s1007_s2] sm:$0x3]  ;;  %s704_s29 = scalar_lea.vmem %s955_s9, 512  ;;  %p1020_p12 = scmp.ne.s32.totalorder %s1016_s10, 0 }
  0x3c   : > { %v368_v24 = vld [vmem:[%s1009_s4] sm:$0xff]  ;;  %p705_p11 = scmp.ne.s32.totalorder %s955_s9, %s704_s29  ;;  %s776_s13 = smov [#allocation6]  }
  0x3d   : > { %s708_s12 = sshll.u32 %s776_s13, 4  ;;  %s709_s12 = int_to_ptr.vmem [resolvable:$false] %s708_s12 }
  0x3e   : > { %276 = vadd.xlane.f32.xlu0 %v275_v5  ;;  %v363_v15 = vstv %s361_s21  ;;  %s960_s21 = scalar_lea.hbm %s1011_s6, %s594_s17  ;;  %p706_p13 = pnand %p705_p11, %p1020_p12 }
  0x3f   : > { %s710_s14 = scalar_lea.vmem %s709_s12, 1024  ;;  %p711_p5 = scmp.lt.s32.totalorder %s955_s9, %s709_s12 }
  0x40   : > { %p707_p4 = pneg %p706_p13  ;;  %p712_p7 = scmp.lt.s32.totalorder %s710_s14, %s704_s29 }
  0x42   : > { %p713_p8 = por %p712_p7, %p711_p5 }
  0x44   : > { %p714_p10 = pnand %p713_p8, %p707_p4 }
  0xc3   : > { %v280_v7 = vpop.xlane.xlu0 %279 }
  0xc4   : > { %v284_v8 = vmul.f32 0.00390625, %v280_v7 }
  0xc6   : > { %602 = vmatpush3.msra.mxu0 %v284_v8 }
  0xc7   : > { %v277_v9 = vpop.xlane.xlu0 %276  ;;  %603 = vmatprep.subr.mxu0 %v773_v6 }
  0xc8   : > { %v283_v10 = vmul.f32 0.00390625, %v277_v9 }
  0xca   : > { %604 = vmatpush3.msra.mxu0 %v283_v10 }
  0xcb   : > { %606 = vmatmul.mubr.msk.f32.vlgmr.msra.gmra.mxu0 %vm287_vm1, %v285_v11 }
 0x18b   : > { %v357_v14 = vpop.f32.mrf.mxu0 }
 0x18c   : > { %v358_v16 = vadd.f32 %v357_v14, %v286_v13 }
 0x18d   : > { %v607_v17 = vpop.f32.mrf.mxu0 }
 0x18e   : > { %vm362_vm3 = vcmp.gt.f32.partialorder %v358_v16, 0.0  ;;  %v364_v18 = vmul.f32 %v363_v15, %v358_v16 }
 0x190   : > { %v365_v19 = vsel %vm362_vm3, %v358_v16, %v364_v18 }
 0x191   : > { %608 = vmatprep.subr.msk.mxu1 %vm377_vm4, %v365_v19 }
 0x192   : > { %609 = vmatpush3.msk.msra.mxu1 %vm377_vm4, %v365_v19 }
 0x193   : > { %611 = vmatmul.mubr.msk.f32.vlgmr.msra.gmra.mxu1 %vm370_vm2, %v367_v20 }
 0x253   : > { %v612_v23 = vpop.f32.mrf.mxu1 }
 0x254   : > { %v453_v25 = vadd.f32 %v612_v23, %v369_v22 }
 0x255   : > { %v447_v26 = vpop.f32.mrf.mxu1 }
 0x256   : > { %v587_v27 = vmul.f32 -1.442695, %v453_v25  ;;  %v448_v28 = vadd.f32 %v447_v26, %v368_v24 }
 0x258   : > { %v586_v29 = vmul.f32 -1.442695, %v448_v28  ;;  %668 = vpow2.f32 %v587_v27 }
 0x25a   : > { %670 = vpow2.f32 %v586_v29 }
 0x265   : > { %v669_v30 = vpop.eup %668 }
 0x266   : > { %v463_v33 = vadd.f32 1.0, %v669_v30 }
 0x267   : > { %v671_v31 = vpop.eup %670 }
 0x268   : > { %v462_v32 = vadd.f32 1.0, %v671_v31 }
 0x26a   : > { %672 = vrcp.f32 %v462_v32 }
 0x26b   : > { %674 = vrcp.f32 %v463_v33 }
 0x277   : > { %v673_v34 = vpop.eup %672 }
 0x278   : > { %470 = vperm.xlu1 %666, %v673_v34   ;;  %v675_v35 = vpop.eup %674 }
 0x27c   : > { %475 = vperm.xlu1 %666, %v675_v35  }
 0x2f3   : > { %v471_v36 = vpop.permute.xlu1 %470 }
 0x2f4   : > { %v478_v37 = vmul.f32 %v471_v36, %v928_v2  ;;  %v479_v38 = vmul.f32 %v471_v36, %v272_v4 }
 0x2f6   : > { %482 = vst [vmem:[%s270_s8] sm:$0xff] %v478_v37  ;;  %483 = vst [vmem:[%s270_s8 + $0x8] sm:$0xff] %v479_v38 }
 0x2f7   : > { %v476_v39 = vpop.permute.xlu1 %475 }
 0x2f8   : > { %v480_v40 = vmul.f32 %v476_v39, %v924_v0  ;;  %v481_v41 = vmul.f32 %v476_v39, %v926_v1 }
 0x2fa   : > { %484 = vst [vmem:[%s270_s8 + $0x10] sm:$0xff] %v480_v40  ;;  %485 = vst [vmem:[%s270_s8 + $0x18] sm:$0xff] %v481_v41 }
 0x2fb   : > { %717 = shalt.err (!%p714_p10)
}
 0x2fc   : > { %s718_s15 = scalar_lea.hbm %s960_s21, 512  ;;  %s722_s22 = scalar_lea.hbm %s1011_s6, 1024 }
 0x2fd   : > { %p719_p0 = scmp.ne.s32.totalorder %s960_s21, %s718_s15  ;;  %p723_p1 = scmp.lt.s32.totalorder %s960_s21, %s1011_s6 }
 0x2fe   : > { %p724_p3 = scmp.lt.s32.totalorder %s722_s22, %s718_s15 }
 0x2ff   : > { %p720_p2 = pnand %p719_p0, %p1020_p12 }
 0x300   : > { %p725_p6 = por %p724_p3, %p723_p1 }
 0x301   : > { %p721_p9 = pneg %p720_p2 }
 0x303   : > { %p726_p11 = pnand %p725_p6, %p721_p9 }
 0x305   : > { %729 = shalt.err (!%p726_p11)
}
 0x306   : > { %s777_s17 = smov 256   ;;  %s778_s19 = smov 16  }
 0x307   : > { %615 = dma.vmem_to_hbm [thread:$0]  (%p1020_p12), %s955_s9, 512, %s960_s21, %s487_s5, %s777_s17, %s777_s17, %s778_s19  }
 0x308 PF: > { %s515_s20 = sand.u32 1, %s756_s23   ;;  %p1021_p13 = scmp.ne.s32.totalorder %s1017_s11, 0 }
 0x309   : > { %p1022_p4 = scmp.ge.s32.totalorder %s768_s26, 2  ;;  %s516_s29 = scalar_lea.sflag [#allocation5], %s515_s20 }
 0x30b   : > { %p622_p5 = pnand %p1022_p4, %p1021_p13 }
 0x30d   : > { %p623_p7 = pneg %p622_p5 }
 0x30f   : > { %751 = dma.done.wait (%p623_p7), %s516_s29, 512  }
 0x310   : > { %753 = vsyncadd (%p623_p7), %s516_s29, 4294966784  ;;  %p20_p8 = scmp.ge.s32.totalorder %s842_s28, 4   ;;  %s1023_s23 = smov %s760_s24 }
 0x311   : > { %s1024_s24 = smov %s764_s25  ;;  %s1025_s25 = smov %s854_s7 }
 0x312   : > { %s1026_s26 = smov %s842_s28  ;;  %22 = sbr.rel (!%p20_p8) target bundleno = 7 (0x7), region = 89 }
 0x317   :  { %521 = vsyncpa [#allocation4], 1 }
 0x318   :  { %523 = vsyncpa [#allocation4 + $0x1], 1 }
 0x319   :  { %524 = vsyncpa [#allocation5], 1 }
 0x31a   :  { %526 = vsyncpa [#allocation5 + $0x1], 1 }

</bundles_post_ra>
